<compile_context>
chip_gen: v6e
topology: v6e:2x2x1
jax: 0.10.0
libtpu: 0.0.40
codegen_flags: <defaults>
</compile_context>

<pallas_src>
import functools

import jax
import jax.numpy as jnp
from jax.experimental import pallas as pl
from jax.experimental.pallas import tpu as pltpu


def _round_up(a, b):
    return (a + b - 1) // b * b


def _chip_config():
    """Generation-specific tiling / VMEM-limit defaults."""
    kind = ""
    try:
        kind = jax.devices()[0].device_kind.lower()
    except Exception:
        pass
    if "v7" in kind or "7x" in kind:
        # 64 MiB physical VMEM: leave headroom, keep tiles modest, feed both TCs.
        return dict(name="v7x", vmem_limit=48 * 2**20, tile_m_cap=256,
                    min_row_tiles=2, mxu=256)
    if "v6" in kind:
        return dict(name="v6e", vmem_limit=100 * 2**20, tile_m_cap=512,
                    min_row_tiles=1, mxu=256)
    if "v5" in kind:
        return dict(name="v5e", vmem_limit=100 * 2**20, tile_m_cap=512,
                    min_row_tiles=1, mxu=128)
    return dict(name="unknown", vmem_limit=64 * 2**20, tile_m_cap=256,
                min_row_tiles=1, mxu=128)


def _pick_tile_m(M, cap, min_tiles):
    """Largest row tile (multiple of 8, <= cap) with small row-padding overhead."""
    cap = max(8, min(cap, _round_up(M, 8)))
    if min_tiles > 1:  # e.g. v7x: make sure both TensorCores get a row tile
        cap = min(cap, max(8, _round_up(-(-M // min_tiles), 8)))
    tol = max(M // 16, 7)  # accept <= ~6% dead rows (t=8 always qualifies)
    best = 8
    for t in range(8, cap + 1, 8):
        if _round_up(M, t) - M <= tol:
            best = t
    return best


def _pick_tile_k(d_hid_p, target):
    """Largest multiple of 128 <= target that divides d_hid_p (no hidden-dim padding)."""
    t = min(_round_up(target, 128), d_hid_p)
    while t > 128 and d_hid_p % t:
        t -= 128
    return t


def _vmem_estimate(tile_m, tile_k, d_in_p, x_bytes, w_bytes):
    """Rough per-step VMEM footprint (double-buffered inputs/outputs + f32 acc)."""
    buf = 2 * tile_m * d_in_p * x_bytes          # x double buffer
    buf += 2 * tile_m * d_in_p * x_bytes         # out double buffer
    buf += 2 * d_in_p * tile_k * w_bytes         # w1 double buffer
    buf += 2 * tile_k * d_in_p * w_bytes         # w2 double buffer
    buf += 2 * 8 * (tile_k + 3 * d_in_p) * 4     # b1/b2/gamma/beta (sublane padded)
    buf += tile_m * d_in_p * 4                   # f32 accumulator scratch
    return buf


def _ffn_kernel(x_ref, w1_ref, b1_ref, w2_ref, b2_ref, g_ref, beta_ref,
                o_ref, acc_ref, *, eps, d_in):
    """Grid: (row_tiles [parallel], d_hid_tiles [arbitrary, reduction])."""
    k = pl.program_id(1)
    nk = pl.num_programs(1)

    @pl.when(k == 0)
    def _init():
        acc_ref[...] = jnp.zeros_like(acc_ref)

    x = x_ref[...]                                             # (TM, d_in_p), input dtype
    xm = x.astype(w1_ref.dtype)                                # MXU operand dtype
    h = jnp.dot(xm, w1_ref[...], preferred_element_type=jnp.float32)
    h = h + b1_ref[...].astype(jnp.float32)
    h = jnp.maximum(h, 0.0).astype(w2_ref.dtype)               # (TM, TK)

    acc_ref[...] += jnp.dot(h, w2_ref[...], preferred_element_type=jnp.float32)

    @pl.when(k == nk - 1)
    def _finalize():
        # TODO(synk): dropout omitted (inference semantics; nn.Dropout is identity in eval).
        y = acc_ref[...] + b2_ref[...].astype(jnp.float32) + x.astype(jnp.float32)
        # Invariant: padded lanes of y are exactly zero (zero-padded x, zero w2 columns,
        # zero b2 padding), so the lane sum equals the sum over valid lanes; the centered
        # term is still explicitly masked for the variance.
        lane = jax.lax.broadcasted_iota(jnp.int32, y.shape, 1)
        valid = lane < d_in
        inv_n = 1.0 / float(d_in)
        mean = jnp.sum(y, axis=-1, keepdims=True) * inv_n
        cen = jnp.where(valid, y - mean, 0.0)
        var = jnp.sum(cen * cen, axis=-1, keepdims=True) * inv_n
        ynorm = cen * jax.lax.rsqrt(var + eps)
        out = ynorm * g_ref[...].astype(jnp.float32) + beta_ref[...].astype(jnp.float32)
        o_ref[...] = out.astype(o_ref.dtype)


def _ffn_forward(x, params, *, d_in, d_in_p, d_hid_p, eps, cfg):
    w1p, b1p, w2p, b2p, g_p, be_p = params
    orig_shape = x.shape
    M = 1
    for s in orig_shape[:-1]:
        M *= s
    x2d = x.reshape(M, d_in)

    x_bytes = x.dtype.itemsize
    w_bytes = w1p.dtype.itemsize
    budget = int(cfg["vmem_limit"] * 0.85)

    tile_m = _pick_tile_m(M, cfg["tile_m_cap"], cfg["min_row_tiles"])

    # Weight-resident mode: single reduction step -> constant weight index maps, so
    # W1/W2 are DMA'd into VMEM once and reused across every row tile.
    if _vmem_estimate(tile_m, d_hid_p, d_in_p, x_bytes, w_bytes) <= budget:
        tile_k = d_hid_p
    else:
        tile_k = _pick_tile_k(d_hid_p, 512)
        while (_vmem_estimate(tile_m, tile_k, d_in_p, x_bytes, w_bytes) > budget
               and tile_k > 128):
            tile_k = _pick_tile_k(d_hid_p, tile_k - 128)
        while (_vmem_estimate(tile_m, tile_k, d_in_p, x_bytes, w_bytes) > budget
               and tile_m > 8):
            tile_m = max(8, (tile_m // 2) // 8 * 8)

    M_p = _round_up(M, tile_m)
    if M_p != M or d_in_p != d_in:
        x2d = jnp.pad(x2d, ((0, M_p - M), (0, d_in_p - d_in)))

    grid = (M_p // tile_m, d_hid_p // tile_k)
    n_row_tiles = grid[0]
    resident = grid[1] == 1

    weight_bytes = (w1p.size + w2p.size) * w_bytes
    weight_stream = weight_bytes if resident else weight_bytes * n_row_tiles
    cost = pl.CostEstimate(
        flops=int(4 * M_p * d_in_p * d_hid_p),
        transcendentals=int(M_p),
        bytes_accessed=int(weight_stream + 2 * M_p * d_in_p * x_bytes),
    )

    out = pl.pallas_call(
        functools.partial(_ffn_kernel, eps=eps, d_in=d_in),
        out_shape=jax.ShapeDtypeStruct((M_p, d_in_p), x.dtype),
        grid_spec=pltpu.PrefetchScalarGridSpec(
            num_scalar_prefetch=0,
            grid=grid,
            in_specs=[
                pl.BlockSpec((tile_m, d_in_p), lambda i, k: (i, 0)),   # x row tile
                pl.BlockSpec((d_in_p, tile_k), lambda i, k: (0, k)),   # w1 K-chunk
                pl.BlockSpec((1, tile_k),      lambda i, k: (0, k)),   # b1 K-chunk
                pl.BlockSpec((tile_k, d_in_p), lambda i, k: (k, 0)),   # w2 K-chunk
                pl.BlockSpec((1, d_in_p),      lambda i, k: (0, 0)),   # b2
                pl.BlockSpec((1, d_in_p),      lambda i, k: (0, 0)),   # LN gamma
                pl.BlockSpec((1, d_in_p),      lambda i, k: (0, 0)),   # LN beta
            ],
            out_specs=pl.BlockSpec((tile_m, d_in_p), lambda i, k: (i, 0)),
            scratch_shapes=[pltpu.VMEM((tile_m, d_in_p), jnp.float32)],
        ),
        compiler_params=pltpu.CompilerParams(
            dimension_semantics=("parallel", "arbitrary"),
            vmem_limit_bytes=int(cfg["vmem_limit"]),
        ),
        cost_estimate=cost,
    )(x2d, w1p, b1p, w2p, b2p, g_p, be_p)

    return out[:M, :d_in].reshape(orig_shape)


class PositionwiseFeedForwardPallas:
    """Inference-mode PositionwiseFeedForward; parameters padded/cast ONCE per layer.

    w1: (d_in, d_hid), w2: (d_hid, d_in)  (transposed vs. nn.Linear.weight).
    Set use_bf16_matmul=True to run the MXU operands in bf16 (f32 accumulation and
    f32 residual/LayerNorm epilogue preserved); default False for exact f32 math.
    """

    def __init__(self, w1, b1, w2, b2, gamma, beta, *, eps=1e-6,
                 use_bf16_matmul=False):
        self.cfg = _chip_config()
        d_in, d_hid = w1.shape
        self.d_in = int(d_in)
        self.eps = float(eps)

        # Lane-dense feature padding; 256-align d_in on 256-wide-MXU chips (v6e/v7x)
        # to avoid half-filled trailing MXU passes.
        align = 256 if (self.cfg["mxu"] == 256 and d_in > 128) else 128
        d_in_p = _round_up(d_in, align)
        d_hid_p = _round_up(d_hid, 128)
        self.d_in_p, self.d_hid_p = d_in_p, d_hid_p

        wdt = jnp.bfloat16 if use_bf16_matmul else w1.dtype
        # Hoisted out of the per-call path: pad + cast the parameters exactly once.
        self.params = (
            jnp.pad(w1, ((0, d_in_p - d_in), (0, d_hid_p - d_hid))).astype(wdt),
            jnp.pad(b1, (0, d_hid_p - d_hid)).reshape(1, d_hid_p),
            jnp.pad(w2, ((0, d_hid_p - d_hid), (0, d_in_p - d_in))).astype(wdt),
            jnp.pad(b2, (0, d_in_p - d_in)).reshape(1, d_in_p),
            jnp.pad(gamma, (0, d_in_p - d_in)).reshape(1, d_in_p),
            jnp.pad(beta, (0, d_in_p - d_in)).reshape(1, d_in_p),
        )

    def __call__(self, x):
        return _ffn_forward(x, self.params, d_in=self.d_in, d_in_p=self.d_in_p,
                            d_hid_p=self.d_hid_p, eps=self.eps, cfg=self.cfg)


def positionwise_ffn(x, w1, b1, w2, b2, gamma, beta, *, eps=1e-6,
                     use_bf16_matmul=False):
    """One-shot functional convenience wrapper (prefer the class to cache padded params)."""
    layer = PositionwiseFeedForwardPallas(w1, b1, w2, b2, gamma, beta, eps=eps,
                                          use_bf16_matmul=use_bf16_matmul)
    return layer(x)


def _reference(x, w1, b1, w2, b2, gamma, beta, eps=1e-6):
    residual = x
    h = jnp.maximum(x @ w1 + b1, 0.0)
    y = h @ w2 + b2
    y = y + residual
    mean = jnp.mean(y, axis=-1, keepdims=True)
    var = jnp.mean((y - mean) ** 2, axis=-1, keepdims=True)
    return (y - mean) / jnp.sqrt(var + eps) * gamma + beta


if __name__ == "__main__":
    key = jax.random.PRNGKey(0)
    d_in, d_hid = 32, 64

    k_x, k_x2, k_w1, k_b1, k_w2, k_b2 = jax.random.split(key, 6)
    # Parameter shapes match nn.Linear / nn.LayerNorm of the module (weights transposed).
    w1 = jax.random.normal(k_w1, (d_in, d_hid), dtype=jnp.float32) * (1.0 / d_in) ** 0.5
    b1 = jax.random.normal(k_b1, (d_hid,), dtype=jnp.float32) * 0.01
    w2 = jax.random.normal(k_w2, (d_hid, d_in), dtype=jnp.float32) * (1.0 / d_hid) ** 0.5
    b2 = jax.random.normal(k_b2, (d_in,), dtype=jnp.float32) * 0.01
    gamma = jnp.ones((d_in,), dtype=jnp.float32)
    beta = jnp.zeros((d_in,), dtype=jnp.float32)

    layer = PositionwiseFeedForwardPallas(w1, b1, w2, b2, gamma, beta)

    # Small shape (single row tile) and a mid-size shape (multiple row tiles / padding).
    x_a = jax.random.normal(k_x, (2, 8, d_in), dtype=jnp.float32)
    x_b = jax.random.normal(k_x2, (3, 100, d_in), dtype=jnp.float32)

    ok = True
    for x in (x_a, x_b):
        out = jax.block_until_ready(layer(x))
        ref = _reference(x, w1, b1, w2, b2, gamma, beta)
        assert out.shape == x.shape
        ok = ok and bool(jnp.allclose(out, ref, atol=1e-4, rtol=1e-4))
    assert ok, "mismatch vs reference"

    print("KERNEL_OK")
</pallas_src>

<mosaic_0001>
module attributes {stable_mosaic.version = 11 : i64} {
  func.func @_ffn_kernel(%arg0: i32, %arg1: i32, %arg2: memref<16x128xf32, #tpu.memory_space<vmem>>, %arg3: memref<128x128xf32, #tpu.memory_space<vmem>>, %arg4: memref<1x128xf32, #tpu.memory_space<vmem>>, %arg5: memref<128x128xf32, #tpu.memory_space<vmem>>, %arg6: memref<1x128xf32, #tpu.memory_space<vmem>>, %arg7: memref<1x128xf32, #tpu.memory_space<vmem>>, %arg8: memref<1x128xf32, #tpu.memory_space<vmem>>, %arg9: memref<16x128xf32, #tpu.memory_space<vmem>>, %arg10: memref<16x128xf32, #tpu.memory_space<vmem>>) attributes {dimension_semantics = [#tpu.dimension_semantics<parallel>, #tpu.dimension_semantics<arbitrary>], iteration_bounds = array<i64: 1, 1>, scalar_prefetch = 0 : i64, scratch_operands = 1 : i64, tpu.core_type = #tpu.core_type<tc>, window_params = [{transform_indices = @transform_0, window_bounds = array<i64: 16, 128>}, {transform_indices = @transform_1, window_bounds = array<i64: 128, 128>}, {transform_indices = @transform_2, window_bounds = array<i64: 1, 128>}, {transform_indices = @transform_3, window_bounds = array<i64: 128, 128>}, {pipeline_mode = #tpu.pipeline_mode<synchronous>, transform_indices = @transform_4, window_bounds = array<i64: 1, 128>}, {pipeline_mode = #tpu.pipeline_mode<synchronous>, transform_indices = @transform_5, window_bounds = array<i64: 1, 128>}, {pipeline_mode = #tpu.pipeline_mode<synchronous>, transform_indices = @transform_6, window_bounds = array<i64: 1, 128>}, {transform_indices = @transform_7, window_bounds = array<i64: 16, 128>}]} {
    %c0_i32 = arith.constant 0 : i32
    %0 = arith.cmpi eq, %arg1, %c0_i32 : i32
    %1 = arith.extui %0 : i1 to i32
    %c0_i32_0 = arith.constant 0 : i32
    %2 = arith.cmpi ne, %1, %c0_i32_0 : i32
    scf.if %2 {
      %cst_16 = arith.constant 0.000000e+00 : f32
      %19 = vector.broadcast %cst_16 : f32 to vector<16x128xf32>
      %c0_17 = arith.constant 0 : index
      %c0_18 = arith.constant 0 : index
      %20 = vector.load %arg10[%c0_17, %c0_18] : memref<16x128xf32, #tpu.memory_space<vmem>>, vector<16x128xf32>
      tpu.vector_store %arg10[%c0_17, %c0_18], %19 {strides = array<i32>} : memref<16x128xf32, #tpu.memory_space<vmem>>, vector<16x128xf32>,
    } else {
    }
    %c0 = arith.constant 0 : index
    %c0_1 = arith.constant 0 : index
    %3 = vector.load %arg2[%c0, %c0_1] : memref<16x128xf32, #tpu.memory_space<vmem>>, vector<16x128xf32>
    %c0_2 = arith.constant 0 : index
    %c0_3 = arith.constant 0 : index
    %4 = vector.load %arg3[%c0_2, %c0_3] : memref<128x128xf32, #tpu.memory_space<vmem>>, vector<128x128xf32>
    %cst = arith.constant dense<0.000000e+00> : vector<16x128xf32>
    %5 = tpu.matmul %3, %4, %cst {dimension_numbers = #tpu.dot_dimension_numbers<[1], [0], [0], [1], [0, 0, 1, 1], [], []>} : vector<16x128xf32>, vector<128x128xf32>, vector<16x128xf32> -> vector<16x128xf32>
    %c0_4 = arith.constant 0 : index
    %c0_5 = arith.constant 0 : index
    %6 = vector.load %arg4[%c0_4, %c0_5] : memref<1x128xf32, #tpu.memory_space<vmem>>, vector<1x128xf32>
    %7 = vector.broadcast %6 : vector<1x128xf32> to vector<16x128xf32>
    %8 = arith.addf %5, %7 : vector<16x128xf32>
    %cst_6 = arith.constant 0.000000e+00 : f32
    %9 = vector.broadcast %cst_6 : f32 to vector<16x128xf32>
    %10 = arith.maximumf %8, %9 : vector<16x128xf32>
    %c0_7 = arith.constant 0 : index
    %c0_8 = arith.constant 0 : index
    %11 = vector.load %arg10[%c0_7, %c0_8] : memref<16x128xf32, #tpu.memory_space<vmem>>, vector<16x128xf32>
    %c0_9 = arith.constant 0 : index
    %c0_10 = arith.constant 0 : index
    %12 = vector.load %arg5[%c0_9, %c0_10] : memref<128x128xf32, #tpu.memory_space<vmem>>, vector<128x128xf32>
    %cst_11 = arith.constant dense<0.000000e+00> : vector<16x128xf32>
    %13 = tpu.matmul %10, %12, %cst_11 {dimension_numbers = #tpu.dot_dimension_numbers<[1], [0], [0], [1], [0, 0, 1, 1], [], []>} : vector<16x128xf32>, vector<128x128xf32>, vector<16x128xf32> -> vector<16x128xf32>
    %14 = arith.addf %11, %13 : vector<16x128xf32>
    %c0_12 = arith.constant 0 : index
    %c0_13 = arith.constant 0 : index
    %15 = vector.load %arg10[%c0_12, %c0_13] : memref<16x128xf32, #tpu.memory_space<vmem>>, vector<16x128xf32>
    tpu.vector_store %arg10[%c0_12, %c0_13], %14 {strides = array<i32>} : memref<16x128xf32, #tpu.memory_space<vmem>>, vector<16x128xf32>,
    %c0_i32_14 = arith.constant 0 : i32
    %16 = arith.cmpi eq, %arg1, %c0_i32_14 : i32
    %17 = arith.extui %16 : i1 to i32
    %c0_i32_15 = arith.constant 0 : i32
    %18 = arith.cmpi ne, %17, %c0_i32_15 : i32
    scf.if %18 {
      %c0_16 = arith.constant 0 : index
      %c0_17 = arith.constant 0 : index
      %19 = vector.load %arg10[%c0_16, %c0_17] : memref<16x128xf32, #tpu.memory_space<vmem>>, vector<16x128xf32>
      %c0_18 = arith.constant 0 : index
      %c0_19 = arith.constant 0 : index
      %20 = vector.load %arg6[%c0_18, %c0_19] : memref<1x128xf32, #tpu.memory_space<vmem>>, vector<1x128xf32>
      %21 = vector.broadcast %20 : vector<1x128xf32> to vector<16x128xf32>
      %22 = arith.addf %19, %21 : vector<16x128xf32>
      %23 = arith.addf %22, %3 : vector<16x128xf32>
      %24 = tpu.iota {dimensions = array<i32: 1>} : vector<16x128xi32>
      %c32_i32 = arith.constant 32 : i32
      %25 = vector.broadcast %c32_i32 : i32 to vector<16x128xi32>
      %26 = arith.cmpi slt, %24, %25 : vector<16x128xi32>
      %cst_20 = arith.constant dense<0.000000e+00> : vector<16xf32>
      %27 = vector.multi_reduction <add>, %23, %cst_20 [1] : vector<16x128xf32> to vector<16xf32>
      %28 = vector.shape_cast %27 : vector<16xf32> to vector<16x1xf32>
      %cst_21 = arith.constant 3.125000e-02 : f32
      %29 = vector.broadcast %cst_21 : f32 to vector<16x1xf32>
      %30 = arith.mulf %28, %29 : vector<16x1xf32>
      %31 = vector.broadcast %30 : vector<16x1xf32> to vector<16x128xf32>
      %32 = arith.subf %23, %31 : vector<16x128xf32>
      %cst_22 = arith.constant 0.000000e+00 : f32
      %33 = vector.broadcast %cst_22 : f32 to vector<16x128xf32>
      %34 = arith.select %26, %32, %33 : vector<16x128xi1>, vector<16x128xf32>
      %35 = arith.mulf %34, %34 : vector<16x128xf32>
      %cst_23 = arith.constant dense<0.000000e+00> : vector<16xf32>
      %36 = vector.multi_reduction <add>, %35, %cst_23 [1] : vector<16x128xf32> to vector<16xf32>
      %37 = vector.shape_cast %36 : vector<16xf32> to vector<16x1xf32>
      %cst_24 = arith.constant 3.125000e-02 : f32
      %38 = vector.broadcast %cst_24 : f32 to vector<16x1xf32>
      %39 = arith.mulf %37, %38 : vector<16x1xf32>
      %cst_25 = arith.constant 9.99999997E-7 : f32
      %40 = vector.broadcast %cst_25 : f32 to vector<16x1xf32>
      %41 = arith.addf %39, %40 : vector<16x1xf32>
      %42 = math.rsqrt %41 : vector<16x1xf32>
      %43 = vector.broadcast %42 : vector<16x1xf32> to vector<16x128xf32>
      %44 = arith.mulf %34, %43 : vector<16x128xf32>
      %c0_26 = arith.constant 0 : index
      %c0_27 = arith.constant 0 : index
      %45 = vector.load %arg7[%c0_26, %c0_27] : memref<1x128xf32, #tpu.memory_space<vmem>>, vector<1x128xf32>
      %46 = vector.broadcast %45 : vector<1x128xf32> to vector<16x128xf32>
      %47 = arith.mulf %44, %46 : vector<16x128xf32>
      %c0_28 = arith.constant 0 : index
      %c0_29 = arith.constant 0 : index
      %48 = vector.load %arg8[%c0_28, %c0_29] : memref<1x128xf32, #tpu.memory_space<vmem>>, vector<1x128xf32>
      %49 = vector.broadcast %48 : vector<1x128xf32> to vector<16x128xf32>
      %50 = arith.addf %47, %49 : vector<16x128xf32>
      %c0_30 = arith.constant 0 : index
      %c0_31 = arith.constant 0 : index
      %51 = vector.load %arg9[%c0_30, %c0_31] : memref<16x128xf32, #tpu.memory_space<vmem>>, vector<16x128xf32>
      tpu.vector_store %arg9[%c0_30, %c0_31], %50 {strides = array<i32>} : memref<16x128xf32, #tpu.memory_space<vmem>>, vector<16x128xf32>,
    } else {
    }
    return
  }
  func.func @transform_0(%arg0: i32, %arg1: i32) -> (i32, i32) {
    %c0_i32 = arith.constant 0 : i32
    %c0_i32_0 = arith.constant 0 : i32
    return %arg0, %c0_i32 : i32, i32
  }
  func.func @transform_1(%arg0: i32, %arg1: i32) -> (i32, i32) {
    %c0_i32 = arith.constant 0 : i32
    %c0_i32_0 = arith.constant 0 : i32
    return %c0_i32, %arg1 : i32, i32
  }
  func.func @transform_2(%arg0: i32, %arg1: i32) -> (i32, i32) {
    %c0_i32 = arith.constant 0 : i32
    %c0_i32_0 = arith.constant 0 : i32
    return %c0_i32, %arg1 : i32, i32
  }
  func.func @transform_3(%arg0: i32, %arg1: i32) -> (i32, i32) {
    %c0_i32 = arith.constant 0 : i32
    %c0_i32_0 = arith.constant 0 : i32
    return %arg1, %c0_i32 : i32, i32
  }
  func.func @transform_4(%arg0: i32, %arg1: i32) -> (i32, i32) {
    %c0_i32 = arith.constant 0 : i32
    %c0_i32_0 = arith.constant 0 : i32
    %c0_i32_1 = arith.constant 0 : i32
    return %c0_i32, %c0_i32_0 : i32, i32
  }
  func.func @transform_5(%arg0: i32, %arg1: i32) -> (i32, i32) {
    %c0_i32 = arith.constant 0 : i32
    %c0_i32_0 = arith.constant 0 : i32
    %c0_i32_1 = arith.constant 0 : i32
    return %c0_i32, %c0_i32_0 : i32, i32
  }
  func.func @transform_6(%arg0: i32, %arg1: i32) -> (i32, i32) {
    %c0_i32 = arith.constant 0 : i32
    %c0_i32_0 = arith.constant 0 : i32
    %c0_i32_1 = arith.constant 0 : i32
    return %c0_i32, %c0_i32_0 : i32, i32
  }
  func.func @transform_7(%arg0: i32, %arg1: i32) -> (i32, i32) {
    %c0_i32 = arith.constant 0 : i32
    %c0_i32_0 = arith.constant 0 : i32
    return %arg0, %c0_i32 : i32, i32
  }
}

</mosaic_0001>

<bundles_post_ra>
// kernel: tpu_custom_call.1
= control target key start
LH: loop header
LB: loop body
LE: loop exit
PB: predicated region body
PF: predicated region fallthrough
CT: control target
= control target key end

     0   :  { %12 = vsyncpa [#allocation4], 0  ;;  %s646_s0 = inlined_call_operand.hbm [shape: f32[16,128], index: 0, kind: input, shape index: {}]   ;;  %s647_s1 = inlined_call_operand.hbm [shape: f32[128,128], index: 1, kind: input, shape index: {}]   ;;  %s648_s2 = inlined_call_operand.vmem [shape: f32[1,128], index: 2, kind: input, shape index: {}]   ;;  %s649_s3 = inlined_call_operand.hbm [shape: f32[128,128], index: 3, kind: input, shape index: {}]   ;;  %s650_s4 = inlined_call_operand.vmem [shape: f32[1,128], index: 4, kind: input, shape index: {}]   ;;  %s651_s5 = inlined_call_operand.vmem [shape: f32[1,128], index: 5, kind: input, shape index: {}]   ;;  %s652_s6 = inlined_call_operand.vmem [shape: f32[1,128], index: 6, kind: input, shape index: {}]   ;;  %s653_s7 = inlined_call_operand.hbm [shape: f32[16,128], index: 7, kind: output, shape index: {}]  }
   0x1   :  { %13 = vsyncpa [#allocation7], 0 }
   0x2   :  { %14 = vsyncpa [#allocation5], 0  ;;  %s560_s24 = smov [#allocation6]   ;;  %s561_s26 = smov [#allocation3]  }
   0x3   :  { %s32_s25 = sshll.u32 %s560_s24, 4  ;;  %s20_s27 = sshll.u32 %s561_s26, 4  ;;  %s33_s25 = int_to_ptr.vmem [resolvable:$true] %s32_s25  ;;  %s21_s27 = int_to_ptr.vmem [resolvable:$true] %s20_s27 }
   0x4   :  { %s482_s28 = scalar_lea.vmem %s33_s25, 2048  ;;  %p487_p1 = scmp.lt.s32.totalorder %s33_s25, %s33_s25 }
   0x5   :  { %p483_p0 = scmp.ne.s32.totalorder %s33_s25, %s482_s28  ;;  %p488_p2 = scmp.lt.s32.totalorder %s482_s28, %s482_s28 }
   0x7   :  { %p489_p3 = por %p488_p2, %p487_p1 }
   0x9   :  { %p490_p4 = pnand %p489_p3, %p483_p0 }
   0xb   :  { %493 = shalt.err (!%p490_p4)
}
   0xc   :  { %s562_s29 = smov 128   ;;  %s563_s30 = smov 8  }
   0xd   :  { %38 = dma.hbm_to_vmem [thread:$0]  %s647_s1, 2048, %s33_s25, [#allocation7], %s562_s29, %s562_s29, %s563_s30  }
   0xe   :  { %s502_s10 = scalar_lea.vmem %s21_s27, 256  ;;  %p507_p6 = scmp.lt.s32.totalorder %s21_s27, %s21_s27 }
   0xf   :  { %p503_p5 = scmp.ne.s32.totalorder %s21_s27, %s502_s10  ;;  %p508_p7 = scmp.lt.s32.totalorder %s502_s10, %s502_s10 }
  0x11   :  { %p509_p8 = por %p508_p7, %p507_p6 }
  0x13   :  { %p510_p9 = pnand %p509_p8, %p503_p5 }
  0x15   :  { %513 = shalt.err (!%p510_p9)
}
  0x16   :  { %26 = dma.hbm_to_vmem [thread:$0]  %s646_s0, 256, %s21_s27, [#allocation4], %s562_s29, %s562_s29, %s563_s30  }
  0x17   :  { %s564_s13 = smov [#allocation8]  }
  0x18   :  { %s46_s14 = sshll.u32 %s564_s13, 4  ;;  %s47_s14 = int_to_ptr.vmem [resolvable:$true] %s46_s14 }
  0x19   :  { %s522_s15 = scalar_lea.vmem %s47_s14, 2048  ;;  %p527_p11 = scmp.lt.s32.totalorder %s47_s14, %s47_s14 }
  0x1a   :  { %p523_p10 = scmp.ne.s32.totalorder %s47_s14, %s522_s15  ;;  %p528_p12 = scmp.lt.s32.totalorder %s522_s15, %s522_s15 }
  0x1c   :  { %p529_p13 = por %p528_p12, %p527_p11 }
  0x1e   :  { %p530_p0 = pnand %p529_p13, %p523_p10 }
  0x20   :  { %533 = shalt.err (!%p530_p0)
}
  0x21   :  { %52 = dma.hbm_to_vmem [thread:$0]  %s649_s3, 2048, %s47_s14, [#allocation7], %s562_s29, %s562_s29, %s563_s30  }
  0x22   :  { %554 = dma.done.wait [#allocation4], 256  }
  0x23   :  { %555 = vsyncadd [#allocation4], 4294967040 }
  0x24   :  { %556 = dma.done.wait [#allocation7], 4096  }
  0x25   :  { %557 = vsyncadd [#allocation7], 4294963200  ;;  %v91_v0 = vld [vmem:[#allocation6 + $0x78] sm:$0xff]  ;;  %v90_v1 = vld [vmem:[#allocation6 + $0x70] sm:$0xff]  ;;  %v289_v48 = vlaneseq  ;;  %s565_s21 = smov [#allocation9]  }
  0x26   :  { %394 = vmatprep.subr.mxu0 %v91_v0  ;;  %v89_v2 = vld [vmem:[#allocation6 + $0x68] sm:$0xff]  ;;  %v88_v3 = vld [vmem:[#allocation6 + $0x60] sm:$0xff]  ;;  %v624_v4 = vld [vmem:[#allocation3] sm:$0xff]  ;;  %s341_s22 = sshll.u32 %s565_s21, 4  ;;  %s342_s22 = int_to_ptr.vmem [resolvable:$true] %s341_s22 }
  0x27   :  { %395 = vmatpush3.msra.mxu0 %v91_v0  ;;  %v87_v5 = vld [vmem:[#allocation6 + $0x58] sm:$0xff]  ;;  %426 = vmatprep.mubr.f32.mxu0 %v624_v4  ;;  %v192_v7 = vld [vmem:[#allocation8 + $0x70] sm:$0xff]  ;;  %v191_v9 = vld [vmem:[#allocation8 + $0x68] sm:$0xff]  ;;  %v290_v49 = vand.u32 127, %v289_v48  ;;  %s534_s23 = scalar_lea.vmem %s342_s22, 256  ;;  %p539_p2 = scmp.lt.s32.totalorder %s342_s22, %s342_s22 }
  0x28   :  { %396 = vmatprep.subr.mxu0 %v90_v1  ;;  %v193_v6 = vld [vmem:[#allocation8 + $0x78] sm:$0xff]  ;;  %v86_v8 = vld [vmem:[#allocation6 + $0x50] sm:$0xff]  ;;  %v85_v10 = vld [vmem:[#allocation6 + $0x48] sm:$0xff]  ;;  %p535_p1 = scmp.ne.s32.totalorder %s342_s22, %s534_s23  ;;  %p540_p3 = scmp.lt.s32.totalorder %s534_s23, %s534_s23 }
  0x29   :  { %397 = vmatpush3.msra.mxu0 %v90_v1  ;;  %429 = vmatprep.subr.mxu1 %v193_v6  ;;  %v190_v11 = vld [vmem:[#allocation8 + $0x60] sm:$0xff]  ;;  %v189_v13 = vld [vmem:[#allocation8 + $0x58] sm:$0xff]  ;;  %v188_v15 = vld [vmem:[#allocation8 + $0x50] sm:$0xff]  ;;  %vm291_vm0 = vcmp.lt.s32.totalorder %v290_v49, 32 }
  0x2a   :  { %398 = vmatprep.subr.mxu0 %v89_v2  ;;  %430 = vmatpush3.msra.mxu1 %v193_v6  ;;  %v84_v12 = vld [vmem:[#allocation6 + $0x40] sm:$0xff]  ;;  %v83_v14 = vld [vmem:[#allocation6 + $0x38] sm:$0xff]  ;;  %v82_v16 = vld [vmem:[#allocation6 + $0x30] sm:$0xff]  ;;  %p541_p4 = por %p540_p3, %p539_p2 }
  0x2b   :  { %399 = vmatpush3.msra.mxu0 %v89_v2  ;;  %431 = vmatprep.subr.mxu1 %v192_v7  ;;  %v187_v17 = vld [vmem:[#allocation8 + $0x48] sm:$0xff]  ;;  %v186_v19 = vld [vmem:[#allocation8 + $0x40] sm:$0xff]  ;;  %v185_v21 = vld [vmem:[#allocation8 + $0x38] sm:$0xff] }
  0x2c   :  { %400 = vmatprep.subr.mxu0 %v88_v3  ;;  %432 = vmatpush3.msra.mxu1 %v192_v7  ;;  %v81_v18 = vld [vmem:[#allocation6 + $0x28] sm:$0xff]  ;;  %v80_v20 = vld [vmem:[#allocation6 + $0x20] sm:$0xff]  ;;  %v79_v22 = vld [vmem:[#allocation6 + $0x18] sm:$0xff]  ;;  %p542_p5 = pnand %p541_p4, %p535_p1 }
  0x2d   :  { %401 = vmatpush3.msra.mxu0 %v88_v3  ;;  %433 = vmatprep.subr.mxu1 %v191_v9  ;;  %v184_v23 = vld [vmem:[#allocation8 + $0x30] sm:$0xff]  ;;  %v183_v25 = vld [vmem:[#allocation8 + $0x28] sm:$0xff]  ;;  %v182_v27 = vld [vmem:[#allocation8 + $0x20] sm:$0xff] }
  0x2e   :  { %402 = vmatprep.subr.mxu0 %v87_v5  ;;  %434 = vmatpush3.msra.mxu1 %v191_v9  ;;  %v78_v24 = vld [vmem:[#allocation6 + $0x10] sm:$0xff]  ;;  %v77_v26 = vld [vmem:[#allocation6 + $0x8] sm:$0xff]  ;;  %v76_v28 = vld [vmem:[#allocation6] sm:$0xff] }
  0x2f   :  { %403 = vmatpush3.msra.mxu0 %v87_v5  ;;  %435 = vmatprep.subr.mxu1 %v190_v11  ;;  %v75_v29 = vld [vmem:[#allocation3 + $0x8] sm:$0xff]  ;;  %v180_v31 = vld [vmem:[#allocation8 + $0x10] sm:$0xff]  ;;  %v179_v32 = vld [vmem:[#allocation8 + $0x8] sm:$0xff] }
  0x30   :  { %404 = vmatprep.subr.mxu0 %v86_v8  ;;  %436 = vmatpush3.msra.mxu1 %v190_v11  ;;  %v181_v30 = vld [vmem:[#allocation8 + $0x18] sm:$0xff]  ;;  %v178_v33 = vld [vmem:[#allocation8] sm:$0xff]  ;;  %v354_v34 = vld [vmem:[%s648_s2] ss:$0 sm:$0xff] }
  0x31   :  { %405 = vmatpush3.msra.mxu0 %v86_v8  ;;  %437 = vmatprep.subr.mxu1 %v189_v13  ;;  %v355_v42 = vld [vmem:[%s650_s4] ss:$0 sm:$0xff] }
  0x32   :  { %406 = vmatprep.subr.mxu0 %v85_v10  ;;  %438 = vmatpush3.msra.mxu1 %v189_v13  ;;  %v356_v3 = vld [vmem:[%s651_s5] ss:$0 sm:$0xff] }
  0x33   :  { %407 = vmatpush3.msra.mxu0 %v85_v10  ;;  %439 = vmatprep.subr.mxu1 %v188_v15  ;;  %v357_v5 = vld [vmem:[%s652_s6] ss:$0 sm:$0xff] }
  0x34   :  { %408 = vmatprep.subr.mxu0 %v84_v12  ;;  %440 = vmatpush3.msra.mxu1 %v188_v15 }
  0x35   :  { %409 = vmatpush3.msra.mxu0 %v84_v12  ;;  %441 = vmatprep.subr.mxu1 %v187_v17 }
  0x36   :  { %410 = vmatprep.subr.mxu0 %v83_v14  ;;  %442 = vmatpush3.msra.mxu1 %v187_v17 }
  0x37   :  { %411 = vmatpush3.msra.mxu0 %v83_v14  ;;  %443 = vmatprep.subr.mxu1 %v186_v19 }
  0x38   :  { %412 = vmatprep.subr.mxu0 %v82_v16  ;;  %444 = vmatpush3.msra.mxu1 %v186_v19 }
  0x39   :  { %413 = vmatpush3.msra.mxu0 %v82_v16  ;;  %445 = vmatprep.subr.mxu1 %v185_v21 }
  0x3a   :  { %414 = vmatprep.subr.mxu0 %v81_v18  ;;  %446 = vmatpush3.msra.mxu1 %v185_v21 }
  0x3b   :  { %415 = vmatpush3.msra.mxu0 %v81_v18  ;;  %447 = vmatprep.subr.mxu1 %v184_v23 }
  0x3c   :  { %416 = vmatprep.subr.mxu0 %v80_v20  ;;  %448 = vmatpush3.msra.mxu1 %v184_v23 }
  0x3d   :  { %417 = vmatpush3.msra.mxu0 %v80_v20  ;;  %449 = vmatprep.subr.mxu1 %v183_v25 }
  0x3e   :  { %418 = vmatprep.subr.mxu0 %v79_v22  ;;  %450 = vmatpush3.msra.mxu1 %v183_v25 }
  0x3f   :  { %419 = vmatpush3.msra.mxu0 %v79_v22  ;;  %451 = vmatprep.subr.mxu1 %v182_v27 }
  0x40   :  { %420 = vmatprep.subr.mxu0 %v78_v24  ;;  %452 = vmatpush3.msra.mxu1 %v182_v27 }
  0x41   :  { %421 = vmatpush3.msra.mxu0 %v78_v24  ;;  %453 = vmatprep.subr.mxu1 %v181_v30 }
  0x42   :  { %422 = vmatprep.subr.mxu0 %v77_v26  ;;  %454 = vmatpush3.msra.mxu1 %v181_v30 }
  0x43   :  { %423 = vmatpush3.msra.mxu0 %v77_v26  ;;  %455 = vmatprep.subr.mxu1 %v180_v31 }
  0x44   :  { %424 = vmatprep.subr.mxu0 %v76_v28  ;;  %456 = vmatpush3.msra.mxu1 %v180_v31 }
  0x45   :  { %425 = vmatpush3.msra.mxu0 %v76_v28  ;;  %457 = vmatprep.subr.mxu1 %v179_v32 }
  0x46   :  { %427 = vmatmul.mubr.f32.vlgmr.msra.gmra.mxu0 %v75_v29  ;;  %458 = vmatpush3.msra.mxu1 %v179_v32 }
  0x47   :  { %459 = vmatprep.subr.mxu1 %v178_v33 }
  0x48   :  { %460 = vmatpush3.msra.mxu1 %v178_v33 }
 0x106   :  { %v428_v35 = vpop.f32.mrf.mxu0 }
 0x107   :  { %v171_v36 = vadd.f32 %v428_v35, %v354_v34 }
 0x108   :  { %v165_v37 = vpop.f32.mrf.mxu0 }
 0x109   :  { %v166_v38 = vadd.f32 %v354_v34, %v165_v37  ;;  %v175_v40 = vmax.f32 %v171_v36, 0.0 }
 0x10b   :  { %v174_v39 = vmax.f32 %v166_v38, 0.0 }
 0x10d   :  { %461 = vmatprep.mubr.f32.mxu1 %v174_v39 }
 0x10e   :  { %462 = vmatmul.mubr.f32.vlgmr.msra.gmra.mxu1 %v175_v40 }
 0x1ce   :  { %v463_v41 = vpop.f32.mrf.mxu1 }
 0x1cf   :  { %v286_v45 = vadd.f32 %v463_v41, %v355_v42 }
 0x1d0   :  { %v260_v43 = vpop.f32.mrf.mxu1 }
 0x1d1   :  { %v285_v44 = vadd.f32 %v355_v42, %v260_v43  ;;  %v288_v47 = vadd.f32 %v286_v45, %v75_v29 }
 0x1d3   :  { %v287_v46 = vadd.f32 %v285_v44, %v624_v4 }
 0x1d5   :  { %292 = vadd.xlane.f32.xlu0 %v287_v46 }
 0x1d9   :  { %294 = vadd.xlane.f32.xlu0 %v288_v47 }
 0x25e   :  { %v293_v50 = vpop.xlane.xlu0 %292 }
 0x25f   :  { %v296_v51 = vmul.f32 0.03125, %v293_v50 }
 0x261   :  { %v298_v52 = vsub.f32 %v287_v46, %v296_v51 }
 0x262   :  { %v295_v53 = vpop.xlane.xlu0 %294 }
 0x263   :  { %v297_v54 = vmul.f32 0.03125, %v295_v53  ;;  %v300_v55 = vsel %vm291_vm0, %v298_v52, 0.0 }
 0x264   :  { %v302_v56 = vmul.f32 %v300_v55, %v300_v55 }
 0x265   :  { %v299_v57 = vsub.f32 %v288_v47, %v297_v54 }
 0x266   :  { %304 = vadd.xlane.f32.xlu1 %v302_v56 }
 0x267   :  { %v301_v58 = vsel %vm291_vm0, %v299_v57, 0.0 }
 0x268   :  { %v303_v59 = vmul.f32 %v301_v58, %v301_v58 }
 0x26a   :  { %306 = vadd.xlane.f32.xlu1 %v303_v59 }
 0x2ef   :  { %v305_v60 = vpop.xlane.xlu1 %304 }
 0x2f0   :  { %v308_v61 = vmul.f32 0.03125, %v305_v60 }
 0x2f2   :  { %v310_v62 = vadd.f32 1e-06, %v308_v61 }
 0x2f3   :  { %v307_v63 = vpop.xlane.xlu1 %306 }
 0x2f4   :  { %470 = vrsqrt.f32 %v310_v62  ;;  %v309_v0 = vmul.f32 0.03125, %v307_v63 }
 0x2f6   :  { %v311_v1 = vadd.f32 1e-06, %v309_v0 }
 0x2f8   :  { %472 = vrsqrt.f32 %v311_v1 }
 0x301   :  { %v471_v2 = vpop.eup %470 }
 0x302   :  { %v314_v4 = vmul.f32 %v471_v2, %v300_v55 }
 0x304   :  { %v323_v6 = vmul.f32 %v356_v3, %v314_v4 }
 0x305   :  { %v473_v7 = vpop.eup %472 }
 0x306   :  { %v315_v8 = vmul.f32 %v473_v7, %v301_v58  ;;  %v332_v9 = vadd.f32 %v357_v5, %v323_v6 }
 0x308   :  { %v324_v10 = vmul.f32 %v356_v3, %v315_v8  ;;  %334 = vst [vmem:[#allocation9] sm:$0xff] %v332_v9 }
 0x30a   :  { %v333_v11 = vadd.f32 %v357_v5, %v324_v10 }
 0x30c   :  { %335 = vst [vmem:[#allocation9 + $0x8] sm:$0xff] %v333_v11 }
 0x30d   :  { %545 = shalt.err (!%p542_p5)
}
 0x30e   :  { %347 = dma.vmem_to_hbm [thread:$0]  %s342_s22, 256, %s653_s7, [#allocation5], %s562_s29, %s562_s29, %s563_s30  }
 0x30f   :  { %558 = dma.done.wait [#allocation5], 256  }
 0x310   :  { %559 = vsyncadd [#allocation5], 4294967040 }
 0x311   :  { %351 = vsyncpa [#allocation4], 1 }
 0x312   :  { %352 = vsyncpa [#allocation7], 1 }
 0x313   :  { %353 = vsyncpa [#allocation5], 1 }

</bundles_post_ra>
